<compile_context>
chip_gen: v7x
topology: tpu7x:2x2x1
jax: 0.10.0
libtpu: 0.0.40
codegen_flags: <defaults>
</compile_context>

<pallas_src>
import functools

import jax
import jax.numpy as jnp
from jax import lax
from jax.experimental import pallas as pl
from jax.experimental.pallas import tpu as pltpu

MARGIN = 2.0
EPS = 1e-6                      # nn.PairwiseDistance default eps

_MAX_BN = 2048                  # full-row (pad-free, no col mask) up to this width
_BN_CHUNKED = 1024              # lane block (multiple of 128) when D > _MAX_BN
_TARGET_TILE_BYTES = 2 * 1024 * 1024   # per-input tile; 2 inputs x 2 buffers = 8 MiB
_MAX_BM = 512                   # caps the unrolled sublane-chunk loop (<= 64 chunks)
_MIN_KERNEL_ELEMS = 64 * 1024   # below this a fused XLA expression wins on overhead


def _contrastive_loss_kernel(o1_ref, o2_ref, lbl_ref, out_ref, acc_ref, *,
                             margin, b, d, bm, bn, ch_m,
                             needs_row_mask, needs_col_mask):
    i = pl.program_id(0)
    j = pl.program_id(1)
    gm = pl.num_programs(0)
    gn = pl.num_programs(1)

    # Per row-tile accumulator lifecycle (axis 1 is the reduction axis).
    @pl.when(j == 0)
    def _init():
        acc_ref[...] = jnp.zeros_like(acc_ref)

    n_chunks = bm // ch_m

    def accumulate(mask_rows, mask_cols):
        # Column-validity mask is identical for every sublane chunk of the tile.
        col_ok = None
        if mask_cols:
            col_ids = j * bn + lax.broadcasted_iota(jnp.int32, (ch_m, bn), 1)
            col_ok = col_ids < d

        # Register-resident partial; one small VMEM RMW per grid step at the end.
        partial = jnp.zeros((ch_m, bn), jnp.float32)
        for si in range(n_chunks):
            r0 = si * ch_m
            # Native-dtype loads; cast to f32 on the VPU (works on v5e too).
            o1 = o1_ref[r0:r0 + ch_m, :].astype(jnp.float32)
            o2 = o2_ref[r0:r0 + ch_m, :].astype(jnp.float32)
            lbl = lbl_ref[r0:r0 + ch_m, :].astype(jnp.float32)   # (ch_m, 1)

            # L2 norm over a size-1 trailing dim == elementwise |o1 - o2 + eps|.
            dist = jnp.abs(o1 - o2 + EPS)
            hinge = jnp.maximum(margin - dist, 0.0)
            d2 = dist * dist
            # (1-l)*d^2 + l*h^2  ==  d^2 + l*(h^2 - d^2)
            per = d2 + lbl * (hinge * hinge - d2)

            ok = col_ok
            if mask_rows:
                row_ids = (i * bm + r0
                           + lax.broadcasted_iota(jnp.int32, (ch_m, bn), 0))
                row_ok = row_ids < b
                ok = row_ok if ok is None else jnp.logical_and(row_ok, ok)
            if ok is not None:
                # Select so NaN/Inf garbage in OOB-padded edge blocks cannot leak.
                per = jnp.where(ok, per, 0.0)

            partial = partial + per

        acc_ref[...] += partial

    if needs_row_mask or needs_col_mask:
        conds = []
        if needs_row_mask:
            conds.append(i == gm - 1)
        if needs_col_mask:
            conds.append(j == gn - 1)
        is_edge = conds[0] if len(conds) == 1 else jnp.logical_or(conds[0], conds[1])

        @pl.when(is_edge)
        def _edge():
            accumulate(needs_row_mask, needs_col_mask)

        @pl.when(jnp.logical_not(is_edge))
        def _interior():
            accumulate(False, False)
    else:
        accumulate(False, False)

    # One partial sum per row-tile (single small XLU reduce at the last j).
    @pl.when(j == gn - 1)
    def _finalize():
        out_ref[0, 0] = jnp.sum(acc_ref[...])


def _auto_blocks(b, d, itemsize):
    """Pick lane-dense, VMEM-safe blocks and the sublane-chunk height."""
    bn = d if d <= _MAX_BN else _BN_CHUNKED
    rows_target = max(8, _TARGET_TILE_BYTES // max(1, bn * itemsize))
    rows_target = min(_MAX_BM, (rows_target // 8) * 8)
    bm = b if b <= rows_target else rows_target
    return bm, bn


def contrastive_loss(output1, output2, label, *, margin=MARGIN,
                     block_m=None, block_n=None, use_kernel=None):
    """output1, output2: (B, D) float (any float dtype); label: (B, 1) -> scalar f32."""
    b, d = output1.shape
    label = jnp.reshape(label, (b, 1))

    if use_kernel is None:
        use_kernel = (b * d >= _MIN_KERNEL_ELEMS
                      or block_m is not None or block_n is not None)
    if not use_kernel:
        # Tiny problems: a plain fused XLA expression beats kernel launch overhead.
        return contrastive_loss_ref(output1, output2, label, margin)

    itemsize = jnp.dtype(output1.dtype).itemsize
    auto_bm, auto_bn = _auto_blocks(b, d, itemsize)
    bm = min(int(block_m), b) if block_m is not None else auto_bm
    bn = min(int(block_n), d) if block_n is not None else auto_bn

    gm = pl.cdiv(b, bm)
    gn = pl.cdiv(d, bn)
    needs_row_mask = (b % bm) != 0
    needs_col_mask = (d % bn) != 0

    # Sublane-chunk height for the register-resident partial / small accumulator.
    ch_m = 8 if bm % 8 == 0 else bm

    kernel = functools.partial(
        _contrastive_loss_kernel,
        margin=float(margin), b=b, d=d, bm=bm, bn=bn, ch_m=ch_m,
        needs_row_mask=needs_row_mask, needs_col_mask=needs_col_mask)

    partials = pl.pallas_call(
        kernel,
        out_shape=jax.ShapeDtypeStruct((gm, 1), jnp.float32),
        grid_spec=pltpu.PrefetchScalarGridSpec(
            num_scalar_prefetch=0,
            grid=(gm, gn),
            in_specs=[
                pl.BlockSpec((bm, bn), lambda i, j: (i, j)),
                pl.BlockSpec((bm, bn), lambda i, j: (i, j)),
                pl.BlockSpec((bm, 1), lambda i, j: (i, 0)),   # label column per row-tile
            ],
            out_specs=pl.BlockSpec((1, 1), lambda i, j: (i, 0),
                                   memory_space=pltpu.MemorySpace.SMEM),
            scratch_shapes=[pltpu.VMEM((ch_m, bn), jnp.float32)],
        ),
        compiler_params=pltpu.CompilerParams(
            # Row axis parallel (uses both TCs on v7x); reduction axis last.
            dimension_semantics=("parallel", "arbitrary")),
    )(output1, output2, label)

    return jnp.sum(partials) * jnp.float32(1.0 / float(b * d))


def contrastive_loss_ref(output1, output2, label, margin=MARGIN):
    o1 = output1.astype(jnp.float32)
    o2 = output2.astype(jnp.float32)
    lbl = label.astype(jnp.float32)
    dist = jnp.abs(o1 - o2 + EPS)
    hinge = jnp.maximum(margin - dist, 0.0)
    return jnp.mean((1.0 - lbl) * dist * dist + lbl * hinge * hinge)


if __name__ == "__main__":
    key = jax.random.PRNGKey(0)
    k1, k2, k3, k4, k5, k6 = jax.random.split(key, 6)

    # Case 1: small f32 shapes matching the original module usage (kernel forced;
    # the auto dispatcher would route this tiny problem to the fused XLA path).
    B, D = 8, 32
    o1 = jax.random.normal(k1, (B, D), dtype=jnp.float32)
    o2 = jax.random.normal(k2, (B, D), dtype=jnp.float32)
    lbl = jax.random.bernoulli(k3, p=0.5, shape=(B, 1)).astype(jnp.float32)
    loss = jax.block_until_ready(contrastive_loss(o1, o2, lbl, use_kernel=True))
    ref = contrastive_loss_ref(o1, o2, lbl)
    assert jnp.allclose(loss, ref, rtol=1e-5, atol=1e-6), (loss, ref)

    # Case 2: bf16 inputs + forced multi-tile grid with row AND column remainder
    # tiles (exercises native-dtype loads, edge-tile mask gating, chunked fold).
    B2, D2 = 20, 200
    o1b = jax.random.normal(k4, (B2, D2), dtype=jnp.bfloat16)
    o2b = jax.random.normal(k5, (B2, D2), dtype=jnp.bfloat16)
    lblb = jax.random.bernoulli(k6, p=0.5, shape=(B2, 1)).astype(jnp.float32)
    loss2 = jax.block_until_ready(
        contrastive_loss(o1b, o2b, lblb, block_m=16, block_n=128))
    ref2 = contrastive_loss_ref(o1b, o2b, lblb)
    assert jnp.allclose(loss2, ref2, rtol=1e-5, atol=1e-6), (loss2, ref2)

    # Case 3: auto-tiling path (full-row lane-dense block, no masking).
    B3, D3 = 96, 384
    o1c = jax.random.normal(k1, (B3, D3), dtype=jnp.float32)
    o2c = jax.random.normal(k2, (B3, D3), dtype=jnp.float32)
    lblc = jax.random.bernoulli(k3, p=0.5, shape=(B3, 1)).astype(jnp.float32)
    loss3 = jax.block_until_ready(contrastive_loss(o1c, o2c, lblc, use_kernel=True))
    ref3 = contrastive_loss_ref(o1c, o2c, lblc)
    assert jnp.allclose(loss3, ref3, rtol=1e-5, atol=1e-6), (loss3, ref3)

    # Case 4: tiny-shape auto dispatch (fused XLA expression, no kernel launch).
    loss4 = jax.block_until_ready(contrastive_loss(o1, o2, lbl))
    assert jnp.allclose(loss4, ref, rtol=1e-5, atol=1e-6), (loss4, ref)

    print("KERNEL_OK")
</pallas_src>

<mosaic_0001>
module attributes {stable_mosaic.version = 11 : i64} {
  func.func @_contrastive_loss_kernel(%arg0: i32, %arg1: i32, %arg2: memref<8x32xf32, #tpu.memory_space<vmem>>, %arg3: memref<8x32xf32, #tpu.memory_space<vmem>>, %arg4: memref<8x1xf32, #tpu.memory_space<vmem>>, %arg5: memref<1x1xf32, #tpu.memory_space<smem>>, %arg6: memref<8x32xf32, #tpu.memory_space<vmem>>) attributes {dimension_semantics = [#tpu.dimension_semantics<parallel>, #tpu.dimension_semantics<arbitrary>], iteration_bounds = array<i64: 1, 1>, scalar_prefetch = 0 : i64, scratch_operands = 1 : i64, tpu.core_type = #tpu.core_type<tc>, window_params = [{transform_indices = @transform_0, window_bounds = array<i64: 8, 32>}, {transform_indices = @transform_1, window_bounds = array<i64: 8, 32>}, {transform_indices = @transform_2, window_bounds = array<i64: 8, 1>}, {transform_indices = @transform_3, window_bounds = array<i64: 1, 1>}]} {
    %c0_i32 = arith.constant 0 : i32
    %0 = arith.cmpi eq, %arg1, %c0_i32 : i32
    %1 = arith.extui %0 : i1 to i32
    %c0_i32_0 = arith.constant 0 : i32
    %2 = arith.cmpi ne, %1, %c0_i32_0 : i32
    scf.if %2 {
      %cst_15 = arith.constant 0.000000e+00 : f32
      %28 = vector.broadcast %cst_15 : f32 to vector<8x32xf32>
      %c0_16 = arith.constant 0 : index
      %c0_17 = arith.constant 0 : index
      %29 = vector.load %arg6[%c0_16, %c0_17] : memref<8x32xf32, #tpu.memory_space<vmem>>, vector<8x32xf32>
      tpu.vector_store %arg6[%c0_16, %c0_17], %28 {strides = array<i32>} : memref<8x32xf32, #tpu.memory_space<vmem>>, vector<8x32xf32>,
    } else {
    }
    %cst = arith.constant 0.000000e+00 : f32
    %3 = vector.broadcast %cst : f32 to vector<8x32xf32>
    %c0 = arith.constant 0 : index
    %c0_1 = arith.constant 0 : index
    %4 = vector.load %arg2[%c0, %c0_1] : memref<8x32xf32, #tpu.memory_space<vmem>>, vector<8x32xf32>
    %c0_2 = arith.constant 0 : index
    %c0_3 = arith.constant 0 : index
    %5 = vector.load %arg3[%c0_2, %c0_3] : memref<8x32xf32, #tpu.memory_space<vmem>>, vector<8x32xf32>
    %c0_4 = arith.constant 0 : index
    %c0_5 = arith.constant 0 : index
    %6 = vector.load %arg4[%c0_4, %c0_5] : memref<8x1xf32, #tpu.memory_space<vmem>>, vector<8x1xf32>
    %7 = arith.subf %4, %5 : vector<8x32xf32>
    %cst_6 = arith.constant 9.99999997E-7 : f32
    %8 = vector.broadcast %cst_6 : f32 to vector<8x32xf32>
    %9 = arith.addf %7, %8 : vector<8x32xf32>
    %10 = math.absf %9 : vector<8x32xf32>
    %cst_7 = arith.constant 2.000000e+00 : f32
    %11 = vector.broadcast %cst_7 : f32 to vector<8x32xf32>
    %12 = arith.subf %11, %10 : vector<8x32xf32>
    %cst_8 = arith.constant 0.000000e+00 : f32
    %13 = vector.broadcast %cst_8 : f32 to vector<8x32xf32>
    %14 = arith.maximumf %12, %13 : vector<8x32xf32>
    %15 = arith.mulf %10, %10 : vector<8x32xf32>
    %16 = arith.mulf %14, %14 : vector<8x32xf32>
    %17 = arith.subf %16, %15 : vector<8x32xf32>
    %18 = vector.broadcast %6 : vector<8x1xf32> to vector<8x32xf32>
    %19 = arith.mulf %18, %17 : vector<8x32xf32>
    %20 = arith.addf %15, %19 : vector<8x32xf32>
    %21 = arith.addf %3, %20 : vector<8x32xf32>
    %c0_9 = arith.constant 0 : index
    %c0_10 = arith.constant 0 : index
    %22 = vector.load %arg6[%c0_9, %c0_10] : memref<8x32xf32, #tpu.memory_space<vmem>>, vector<8x32xf32>
    %23 = arith.addf %22, %21 : vector<8x32xf32>
    %c0_11 = arith.constant 0 : index
    %c0_12 = arith.constant 0 : index
    %24 = vector.load %arg6[%c0_11, %c0_12] : memref<8x32xf32, #tpu.memory_space<vmem>>, vector<8x32xf32>
    tpu.vector_store %arg6[%c0_11, %c0_12], %23 {strides = array<i32>} : memref<8x32xf32, #tpu.memory_space<vmem>>, vector<8x32xf32>,
    %c0_i32_13 = arith.constant 0 : i32
    %25 = arith.cmpi eq, %arg1, %c0_i32_13 : i32
    %26 = arith.extui %25 : i1 to i32
    %c0_i32_14 = arith.constant 0 : i32
    %27 = arith.cmpi ne, %26, %c0_i32_14 : i32
    scf.if %27 {
      %c0_15 = arith.constant 0 : index
      %c0_16 = arith.constant 0 : index
      %28 = vector.load %arg6[%c0_15, %c0_16] : memref<8x32xf32, #tpu.memory_space<vmem>>, vector<8x32xf32>
      %29 = vector.shape_cast %28 : vector<8x32xf32> to vector<1x8x32xf32>
      %cst_17 = arith.constant dense<0.000000e+00> : vector<1xf32>
      %30 = vector.multi_reduction <add>, %29, %cst_17 [1, 2] : vector<1x8x32xf32> to vector<1xf32>
      %31 = vector.shape_cast %30 : vector<1xf32> to vector<1x1x1xf32>
      %32 = vector.extract %31[0, 0, 0] : f32 from vector<1x1x1xf32>
      %c0_18 = arith.constant 0 : index
      %c0_19 = arith.constant 0 : index
      %33 = memref.load %arg5[%c0_18, %c0_19] : memref<1x1xf32, #tpu.memory_space<smem>>
      memref.store %32, %arg5[%c0_18, %c0_19] : memref<1x1xf32, #tpu.memory_space<smem>>
    } else {
    }
    return
  }
  func.func @transform_0(%arg0: i32, %arg1: i32) -> (i32, i32) {
    %c0_i32 = arith.constant 0 : i32
    return %arg0, %arg1 : i32, i32
  }
  func.func @transform_1(%arg0: i32, %arg1: i32) -> (i32, i32) {
    %c0_i32 = arith.constant 0 : i32
    return %arg0, %arg1 : i32, i32
  }
  func.func @transform_2(%arg0: i32, %arg1: i32) -> (i32, i32) {
    %c0_i32 = arith.constant 0 : i32
    %c0_i32_0 = arith.constant 0 : i32
    return %arg0, %c0_i32 : i32, i32
  }
  func.func @transform_3(%arg0: i32, %arg1: i32) -> (i32, i32) {
    %c0_i32 = arith.constant 0 : i32
    %c0_i32_0 = arith.constant 0 : i32
    return %arg0, %c0_i32 : i32, i32
  }
}

</mosaic_0001>

<bundles_post_ra>
// kernel: tpu_custom_call.1
= control target key start
LH: loop header
LB: loop body
LE: loop exit
PB: predicated region body
PF: predicated region fallthrough
CT: control target
= control target key end

     0   :  { %8 = vsyncpa [#allocation4], 0  ;;  %s186_s0 = inlined_call_operand.vmem [shape: f32[8,32], index: 0, kind: input, shape index: {}]   ;;  %s187_s1 = inlined_call_operand.hbm [shape: f32[8,32], index: 1, kind: input, shape index: {}]   ;;  %s188_s2 = inlined_call_operand.vmem [shape: f32[8,1], index: 2, kind: input, shape index: {}]   ;;  %s189_s3 = inlined_call_operand.hbm [shape: f32[1,1], index: 3, kind: output, shape index: {}]  }
   0x1   :  { %9 = vsyncpa [#allocation5], 0  ;;  %s129_s12 = smov [#allocation3]   ;;  %s93_s16 = scalar_lea.hbm %s187_s1, 128 }
   0x2   :  { %s18_s13 = sshll.u32 %s129_s12, 4  ;;  %p94_p0 = scmp.ne.s32.totalorder %s187_s1, %s93_s16  ;;  %s19_s13 = int_to_ptr.vmem [resolvable:$true] %s18_s13 }
   0x3   :  { %p97_p1 = scmp.lt.u32.totalorder %s93_s16, %s187_s1 }
   0x5   :  { %p99_p2 = pnand %p97_p1, %p94_p0 }
   0x7   :  { %102 = shalt.err (!%p99_p2)
}
   0x8   :  { %s103_s21 = scalar_lea.vmem %s19_s13, 128  ;;  %p108_p4 = scmp.lt.s32.totalorder %s19_s13, %s19_s13 }
   0x9   :  { %p104_p3 = scmp.ne.s32.totalorder %s19_s13, %s103_s21  ;;  %p109_p5 = scmp.lt.s32.totalorder %s103_s21, %s103_s21 }
   0xb   :  { %p110_p6 = por %p109_p5, %p108_p4 }
   0xd   :  { %p111_p7 = pnand %p110_p6, %p104_p3 }
   0xf   :  { %114 = shalt.err (!%p111_p7)
}
  0x10   :  { %21 = dma.hbm_to_vmem [thread:$0]  %s187_s1, 128, %s19_s13, [#allocation4]  }
  0x11   :  { %125 = dma.done.wait [#allocation4], 128  }
  0x12   :  { %126 = vsyncadd [#allocation4], 4294967168  ;;  %v130_v0 = vmov 0   ;;  %vm31_vm0 = vcmask 261120   ;;  %v131_v1 = vmov 0.0   ;;  %v35_v2 = vld [vmem:[%s188_s2] sm:$0xff] }
  0x13   :  { %92 = vset.pattern.permute.xlu0 %v130_v0  ;;  %32 = vst.msk [vmem:[#allocation2] sm:$0xff] %vm31_vm0, %v131_v1  ;;  %v33_v3 = vld [vmem:[%s186_s0] sm:$0xff]  ;;  %v34_v4 = vld [vmem:[#allocation3] sm:$0xff]  ;;  %s115_s28 = scalar_lea.hbm %s189_s3, 16 }
  0x14   :  { %46 = vperm.xlu0 %92, %v35_v2   ;;  %v36_v5 = vsub.f32 %v33_v3, %v34_v4  ;;  %p116_p8 = scmp.ne.s32.totalorder %s189_s3, %s115_s28  ;;  %p119_p9 = scmp.lt.u32.totalorder %s115_s28, %s189_s3 }
  0x16   :  { %v37_v6 = vadd.f32 1e-06, %v36_v5  ;;  %p121_p10 = pnand %p119_p9, %p116_p8 }
  0x18   :  { %v38_v7 = vand.u32 2147483647, %v37_v6 }
  0x1a   :  { %v39_v8 = vsub.f32 2.0, %v38_v7  ;;  %v41_v10 = vmul.f32 %v38_v7, %v38_v7  ;;  %v52_v15 = vld [vmem:[#allocation2] sm:$0xff] }
  0x1c   :  { %v40_v9 = vmax.f32 %v39_v8, 0.0 }
  0x1e   :  { %v42_v11 = vmul.f32 %v40_v9, %v40_v9 }
  0x20   :  { %v43_v12 = vsub.f32 %v42_v11, %v41_v10 }
  0x93   :  { %v47_v13 = vpop.permute.xlu0 %46 }
  0x94   :  { %v49_v14 = vmul.f32 %v47_v13, %v43_v12 }
  0x96   :  { %v50_v16 = vadd.f32 %v49_v14, %v41_v10 }
  0x98   :  { %v53_v17 = vadd.f32 %v52_v15, %v50_v16 }
  0x9a   :  { %55 = vst.msk [vmem:[#allocation2] sm:$0xff] %vm31_vm0, %v53_v17 }
  0xa1   :  { %v59_v18 = vld [vmem:[#allocation2] sm:$0xff] }
  0xa2   :  { %v60_v19 = vsel %vm31_vm0, %v59_v18, 0.0 }
  0xa3   :  { %61 = vadd.xlane.f32.xlu0 %v60_v19 }
 0x130   :  { %v62_v20 = vpop.xlane.xlu0 %61 }
 0x131   :  { %v63_v21 = vrot.slane %v62_v20, 4 }
 0x133   :  { %v64_v22 = vadd.f32 %v63_v21, %v62_v20 }
 0x135   :  { %v65_v23 = vrot.slane %v64_v22, 2 }
 0x137   :  { %v66_v24 = vadd.f32 %v65_v23, %v64_v22 }
 0x139   :  { %v67_v25 = vrot.slane %v66_v24, 1 }
 0x13b   :  { %v68_v26 = vadd.f32 %v67_v25, %v66_v24 }
 0x13d   :  { %86 = vpush %v68_v26 }
 0x16e   :  { %s87_s0 = spop %86 }
 0x16f   :  { %71 = sst [smem:[#allocation6]] %s87_s0 }
 0x170   :  { %124 = shalt.err (!%p121_p10)
}
 0x171   :  { %s132_s6 = smov [#allocation6]  }
 0x172   :  { %79 = dma.smem_to_hbm %s132_s6, 16, %s189_s3, [#allocation5]  }
 0x173   :  { %127 = dma.done.wait [#allocation5], 16  }
 0x174   :  { %128 = vsyncadd [#allocation5], 4294967280 }
 0x175   :  { %83 = sfence }
 0x176   :  { %84 = vsyncpa [#allocation4], 1 }
 0x177   :  { %85 = vsyncpa [#allocation5], 1 }

</bundles_post_ra>
